<compile_context>
chip_gen: v5e
topology: v5e:2x2
jax: 0.10.0
libtpu: 0.0.40
codegen_flags: <defaults>
</compile_context>

<pallas_src>
import math

import jax
import jax.numpy as jnp
from jax.experimental import pallas as pl
from jax.experimental.pallas import tpu as pltpu


def _cls_embed_kernel(w_ref, out_ref):
    # w_ref:   (1, C)  lane-dense weight row (r tiled copies of the CLS vec).
    # out_ref: (TB, C) output slab tile; every row is the weight row.
    # The sublane broadcast is VPU/vst work that is fully hidden under the
    # output HBM DMA (kernel is write-bound).
    out_ref[...] = jnp.broadcast_to(w_ref[...], out_ref.shape)


def _sublane_pack(dtype) -> int:
    # Sublane pack factor: f32 -> 8, bf16/f16 -> 16, int8/fp8 -> 32.
    return max(8, 32 // jnp.dtype(dtype).itemsize)


def _scoped_vmem_cap() -> int:
    """Generation-aware scoped-VMEM cap (leave ~25% headroom for Mosaic)."""
    try:
        cap = int(pltpu.get_tpu_info().vmem_capacity_bytes)
    except Exception:
        cap = 64 << 20  # conservative: v7x per-TensorCore physical VMEM
    return max((cap * 3) // 4, 16 << 20)


def _num_tensorcores() -> int:
    """Best-effort TensorCore-per-chip count (v7x has 2, v5e/v6e have 1)."""
    try:
        info = pltpu.get_tpu_info()
        for name in ("num_cores", "num_tensorcores", "tensorcore_count",
                     "cores_per_chip"):
            n = getattr(info, name, None)
            if n is not None:
                return 2 if int(n) >= 2 else 1
    except Exception:
        pass
    return 2  # assume 2 TCs; the extra split costs ~0.35 us on 1-TC parts


def _lane_waste(c: int) -> float:
    """Fraction of lane width wasted by masked stores for a row of C elems."""
    lanes = pl.cdiv(c, 128) * 128
    return (lanes - c) / lanes


def _choose_repeat(b: int, d: int, itemsize: int, pack: int,
                   out_budget: int) -> int:
    """Pick r (r | b): output viewed as (b//r, r*d); maximize lane density."""
    max_c = max(out_budget // (pack * itemsize), d)  # always allow r = 1
    r0 = 128 // math.gcd(d, 128)  # minimal r with (r*d) % 128 == 0
    if b % r0 == 0 and r0 * d <= max_c:
        return r0  # exact lane density
    # No multiple of r0 divides b -> search divisors of b for the least
    # lane-mask waste (ties -> smaller r, keeps more sublane rows).
    best_r, best_w = 1, _lane_waste(d)
    f = 1
    while f * f <= b:
        if b % f == 0:
            for r in (f, b // f):
                if r * d <= max_c:
                    w = _lane_waste(r * d)
                    if w < best_w - 1e-12 or (abs(w - best_w) < 1e-12
                                              and r < best_r):
                        best_r, best_w = r, w
        f += 1
    return best_r


def _tile_rows_and_grid(rows: int, row_bytes: int, pack: int,
                        out_budget: int, num_cores: int):
    """Row-tile size + grid: big tiles, balanced blocks, TC-count-aware."""
    budget_rows = max((out_budget // row_bytes) // pack * pack, pack)
    if budget_rows >= rows:
        # Whole output fits one tile; split only if there is enough work to
        # keep both TensorCores of a 2-TC part busy.
        nsteps = num_cores if rows >= 2 * pack * num_cores else 1
    else:
        nsteps = pl.cdiv(rows, budget_rows)
        # Small grids: step count a multiple of the TC count -> balanced.
        if (num_cores > 1 and nsteps < 8 and nsteps % num_cores
                and rows >= num_cores * pack):
            nsteps = pl.cdiv(nsteps, num_cores) * num_cores
    if nsteps <= 1:
        return rows, 1  # single block; block dims == array dims
    # Balanced tile: derive rows-per-step from the step count (shaves the
    # last tile instead of leaving a big padded partial block).
    tile_rows = pl.cdiv(pl.cdiv(rows, nsteps), pack) * pack
    tile_rows = min(tile_rows, rows)
    return tile_rows, pl.cdiv(rows, tile_rows)


def cls_embedding(weight: jax.Array, batch_dims, *,
                  vmem_tile_bytes: int = 16 * 1024 * 1024) -> jax.Array:
    """Pallas equivalent of CLSEmbedding.forward(batch_dims)."""
    if not batch_dims:
        raise ValueError("The input must be non-empty")

    d = int(weight.shape[-1])
    b = 1
    for s in batch_dims:
        b *= int(s)

    dtype = weight.dtype
    itemsize = jnp.dtype(dtype).itemsize
    pack = _sublane_pack(dtype)

    # ---- Generation-aware VMEM budget: 2 out buffers + 2 (sublane-padded)
    # weight buffers + slack must stay under the scoped cap.
    scoped_cap = _scoped_vmem_cap()
    slack = 2 << 20
    out_budget = max(min(int(vmem_tile_bytes), (scoped_cap - slack) // 4),
                     1 << 20)

    # ---- Lane-dense re-slab: output viewed as (rows, C), C = r*d, r | b.
    r = _choose_repeat(b, d, itemsize, pack, out_budget)
    c = r * d
    rows = b // r

    # ---- Row tile and grid from the VMEM budget, balanced and TC-aware.
    num_cores = _num_tensorcores()
    tile_rows, grid_rows = _tile_rows_and_grid(rows, c * itemsize, pack,
                                               out_budget, num_cores)

    padded_tile = pl.cdiv(tile_rows, pack) * pack
    vmem_needed = (2 * padded_tile * c + 2 * pack * c) * itemsize + slack
    vmem_limit = int(min(max(vmem_needed, 16 << 20), scoped_cap))

    # Weight presented as one lane-dense row of r copies of the CLS vector.
    w_row = jnp.tile(weight.reshape(1, d), (1, r))  # (1, C)

    out_slab = pl.pallas_call(
        _cls_embed_kernel,
        out_shape=jax.ShapeDtypeStruct((rows, c), dtype),
        grid_spec=pltpu.PrefetchScalarGridSpec(
            num_scalar_prefetch=0,
            grid=(grid_rows,),
            in_specs=[pl.BlockSpec((1, c), lambda i: (0, 0))],
            out_specs=pl.BlockSpec((tile_rows, c), lambda i: (i, 0)),
        ),
        compiler_params=pltpu.CompilerParams(
            dimension_semantics=("parallel",),
            vmem_limit_bytes=vmem_limit,
        ),
    )(w_row)

    # (rows, C) is the same row-major buffer as (B, D): reshape back is free.
    return out_slab.reshape(*batch_dims, 1, d)


def init_cls_weight(key, d_embedding: int, dtype=jnp.float32) -> jax.Array:
    # Matches nn.init.uniform_(-d^-0.5, d^-0.5)
    d_rsqrt = d_embedding ** (-0.5)
    return jax.random.uniform(
        key, (d_embedding,), dtype=dtype, minval=-d_rsqrt, maxval=d_rsqrt
    )


if __name__ == "__main__":
    key = jax.random.PRNGKey(0)
    d_embedding = 32
    weight = init_cls_weight(key, d_embedding)

    # Case 1: perfect lane-dense path (B=16 divisible by r0=4 -> C=128 slab).
    bd1 = (2, 8)
    out1 = jax.block_until_ready(cls_embedding(weight, bd1))
    ref1 = jnp.broadcast_to(weight, (*bd1, 1, d_embedding))
    assert out1.shape == ref1.shape and out1.dtype == weight.dtype
    assert jnp.array_equal(out1, ref1), "mismatch vs reference (case 1)"

    # Case 2: B=15 not divisible by r0 -> divisor search (r=15, C=480 slab),
    # replacing the old masked C=d fallback.
    bd2 = (3, 5)
    out2 = jax.block_until_ready(cls_embedding(weight, bd2))
    ref2 = jnp.broadcast_to(weight, (*bd2, 1, d_embedding))
    assert out2.shape == ref2.shape
    assert jnp.array_equal(out2, ref2), "mismatch vs reference (case 2)"

    # Case 3: larger batch -> multi-step balanced grid over the row axis.
    bd3 = (256,)
    out3 = jax.block_until_ready(cls_embedding(weight, bd3))
    ref3 = jnp.broadcast_to(weight, (*bd3, 1, d_embedding))
    assert out3.shape == ref3.shape
    assert jnp.array_equal(out3, ref3), "mismatch vs reference (case 3)"

    # Case 4: bf16 (sublane pack factor 16).
    w_bf16 = weight.astype(jnp.bfloat16)
    bd4 = (4, 8)
    out4 = jax.block_until_ready(cls_embedding(w_bf16, bd4))
    ref4 = jnp.broadcast_to(w_bf16, (*bd4, 1, d_embedding))
    assert out4.dtype == jnp.bfloat16
    assert jnp.array_equal(out4, ref4), "mismatch vs reference (case 4)"

    print("KERNEL_OK")
</pallas_src>

<mosaic_0001>
module attributes {stable_mosaic.version = 11 : i64} {
  func.func @_cls_embed_kernel(%arg0: i32, %arg1: memref<1x128xf32, #tpu.memory_space<vmem>>, %arg2: memref<4x128xf32, #tpu.memory_space<vmem>>) attributes {dimension_semantics = [#tpu.dimension_semantics<parallel>], iteration_bounds = array<i64: 1>, scalar_prefetch = 0 : i64, scratch_operands = 0 : i64, tpu.core_type = #tpu.core_type<tc>, window_params = [{pipeline_mode = #tpu.pipeline_mode<synchronous>, transform_indices = @transform_0, window_bounds = array<i64: 1, 128>}, {transform_indices = @transform_1, window_bounds = array<i64: 4, 128>}]} {
    %c0 = arith.constant 0 : index
    %c0_0 = arith.constant 0 : index
    %0 = vector.load %arg1[%c0, %c0_0] : memref<1x128xf32, #tpu.memory_space<vmem>>, vector<1x128xf32>
    %1 = vector.shape_cast %0 : vector<1x128xf32> to vector<1x128xf32>
    %2 = vector.broadcast %1 : vector<1x128xf32> to vector<4x128xf32>
    %c0_1 = arith.constant 0 : index
    %c0_2 = arith.constant 0 : index
    %3 = vector.load %arg2[%c0_1, %c0_2] : memref<4x128xf32, #tpu.memory_space<vmem>>, vector<4x128xf32>
    tpu.vector_store %arg2[%c0_1, %c0_2], %2 {strides = array<i32>} : memref<4x128xf32, #tpu.memory_space<vmem>>, vector<4x128xf32>,
    return
  }
  func.func @transform_0(%arg0: i32) -> (i32, i32) {
    %c0_i32 = arith.constant 0 : i32
    %c0_i32_0 = arith.constant 0 : i32
    %c0_i32_1 = arith.constant 0 : i32
    return %c0_i32, %c0_i32_0 : i32, i32
  }
  func.func @transform_1(%arg0: i32) -> (i32, i32) {
    %c0_i32 = arith.constant 0 : i32
    %c0_i32_0 = arith.constant 0 : i32
    return %arg0, %c0_i32 : i32, i32
  }
}

</mosaic_0001>

<bundles_post_ra>
// kernel: tpu_custom_call.1
= control target key start
LH: loop header
LB: loop body
LE: loop exit
PB: predicated region body
PF: predicated region fallthrough
CT: control target
= control target key end

     0   :  { %6 = vsyncpa [#allocation3], 0  ;;  %s118_s0 = inlined_call_operand.hbm [shape: f32[1,128], index: 0, kind: input, shape index: {}]   ;;  %s119_s1 = inlined_call_operand.hbm [shape: f32[4,128], index: 1, kind: output, shape index: {}]  }
   0x1   :  { %7 = vsyncpa [#allocation4], 0  ;;  %s13_s8 = sshll.u32 %s118_s0, 4  ;;  %s100_s9 = smov [#allocation2]   ;;  %s14_s8 = int_to_ptr.hbm [resolvable:$true] %s13_s8 }
   0x2   :  { %s15_s10 = sshll.u32 %s100_s9, 4  ;;  %s16_s10 = int_to_ptr.vmem [resolvable:$true] %s15_s10 }
   0x3   :  { %18 = dma.hbm_to_vmem [thread:$0]  %s14_s8, 16, %s16_s10, [#allocation3]  }
   0x4   :  { %96 = dma.done.wait [#allocation3], 16  }
   0x5   :  { %97 = vsyncadd [#allocation3], 4294967280  ;;  %s101_s11 = smov [#allocation5]   ;;  %s35_s15 = sshll.u32 %s119_s1, 4  ;;  %v47_v0 = vld [vmem:[#allocation2] ss:$0 sm:$0xff]  ;;  %s36_s15 = int_to_ptr.hbm [resolvable:$true] %s35_s15 }
   0x6   :  { %s33_s12 = sshll.u32 %s101_s11, 4  ;;  %27 = vst [vmem:[#allocation5] sm:$0xf] %v47_v0  ;;  %s34_s12 = int_to_ptr.vmem [resolvable:$true] %s33_s12 }
   0x7   :  { %38 = dma.vmem_to_hbm [thread:$0]  %s34_s12, 64, %s36_s15, [#allocation4]  }
   0x8   :  { %98 = dma.done.wait [#allocation4], 64  }
   0x9   :  { %99 = vsyncadd [#allocation4], 4294967232 }
   0xa   :  { %43 = vsyncpa [#allocation3], 1 }
   0xb   :  { %44 = vsyncpa [#allocation4], 1 }

</bundles_post_ra>
